<compile_context>
chip_gen: v5e
topology: v5e:2x2
jax: 0.10.0
libtpu: 0.0.40
codegen_flags: <defaults>
</compile_context>

<pallas_src>
import jax
import jax.numpy as jnp
from jax.experimental import pallas as pl
from jax.experimental.pallas import tpu as pltpu


def _round_up(v, m):
    return ((v + m - 1) // m) * m


def _make_head_kernel(compute_dtype):
    """kernel(x_ref, w_ref, b_ref, o_ref): one batch tile of x @ W + b."""

    def kernel(x_ref, w_ref, b_ref, o_ref):
        # x_ref: (TB, D) native dtype, w_ref: (D, Lp), b_ref: (1, Lp) f32,
        # o_ref: (TB, Lp).  W/bias have constant block indices -> resident.
        x = x_ref[...]
        w = w_ref[...]
        if compute_dtype is not None:
            # Opt-in low-precision matmul inputs; cast happens in VMEM so it
            # costs no HBM traffic.  Accumulation stays f32 below.
            x = x.astype(compute_dtype)
            w = w.astype(compute_dtype)
        acc = jnp.dot(x, w, preferred_element_type=jnp.float32)
        o_ref[...] = (acc + b_ref[...]).astype(o_ref.dtype)

    return kernel


def multiple_choice_head_forward(x, w_linear, b_linear, *,
                                 tile_b=None, compute_dtype=None):
    """Surviving part of MultipleChoiceHead.forward: linear(input).

    x:        [B, D]
    w_linear: [D, L]  (transposed PyTorch nn.Linear weight)
    b_linear: [L]
    returns:  [B, L] in x.dtype
    """
    B, D = x.shape
    L = w_linear.shape[1]
    out_dtype = x.dtype

    # Lane-dense output: pad the label axis to exactly one 128-lane multiple.
    Lp = _round_up(L, 128)

    # Padded W / bias are tiny (D*128 and 128 elements) -> cheap host copies.
    w_p = (jnp.zeros((D, Lp), jnp.float32)
           .at[:, :L].set(w_linear.astype(jnp.float32)))
    b_p = (jnp.zeros((1, Lp), jnp.float32)
           .at[0, :L].set(b_linear.astype(jnp.float32)))

    # Batch tile: as big as the VMEM budget allows (x is double-buffered, keep
    # <= ~8 MiB per buffer), capped at 1024 rows; at least 2 grid steps when
    # the batch allows so v7x can use both TensorCores on the parallel axis.
    if tile_b is None:
        bytes_per_row = max(1, D * x.dtype.itemsize)
        per_buffer_budget = 8 << 20
        tile_b = max(8, min(1024, (per_buffer_budget // bytes_per_row) // 8 * 8))
        if B > 16 and tile_b >= B:
            tile_b = max(8, _round_up(pl.cdiv(B, 2), 8))
    tile_b = int(min(tile_b, _round_up(B, 8)))
    assert tile_b % 8 == 0, "tile_b must be a multiple of 8"
    grid_b = pl.cdiv(B, tile_b)  # uneven last tile handled by Pallas masking

    # Raise the scoped-VMEM limit only when the tiles actually need it
    # (v5e default 16 MiB, v6e/v7x 32 MiB); stay well under v7x's 64 MiB.
    vmem_need = 2 * (tile_b * D * x.dtype.itemsize   # x double buffer
                     + D * Lp * 4                    # resident W
                     + Lp * 4                        # resident bias
                     + tile_b * Lp * 4)              # output tile
    cp_kwargs = dict(dimension_semantics=("parallel",))
    if vmem_need > (12 << 20):
        cp_kwargs["vmem_limit_bytes"] = int(min(vmem_need + (4 << 20), 48 << 20))

    out = pl.pallas_call(
        _make_head_kernel(compute_dtype),
        out_shape=jax.ShapeDtypeStruct((B, Lp), out_dtype),
        grid_spec=pltpu.PrefetchScalarGridSpec(
            num_scalar_prefetch=0,
            grid=(grid_b,),
            in_specs=[
                pl.BlockSpec((tile_b, D), lambda i: (i, 0)),   # x: streamed
                pl.BlockSpec((D, Lp), lambda i: (0, 0)),       # W: resident
                pl.BlockSpec((1, Lp), lambda i: (0, 0)),       # b: resident
            ],
            out_specs=pl.BlockSpec((tile_b, Lp), lambda i: (i, 0)),
        ),
        compiler_params=pltpu.CompilerParams(**cp_kwargs),
    )(x, w_p, b_p)

    # Drop the lane padding.  (In a fused pipeline, hand the padded slab to
    # the consumer instead so XLA does not re-read it just to slice.)
    return out[:, :L]


def init_params(key, input_dim, num_labels):
    """Deterministic params mirroring MultipleChoiceHead.__init__ shapes."""
    k1, k2, k3, _ = jax.random.split(key, 4)
    # pooler.dense: Linear(input_dim, input_dim) -- dead code in forward,
    # created only to mirror the module's parameter set.
    w_pooler = jax.random.normal(k1, (input_dim, input_dim), jnp.float32) * 0.02
    b_pooler = jnp.zeros((input_dim,), jnp.float32)
    # linear: Linear(input_dim, num_labels), stored transposed as [D, L]
    w_linear = jax.random.normal(k2, (input_dim, num_labels), jnp.float32) * 0.02
    b_linear = jax.random.normal(k3, (num_labels,), jnp.float32) * 0.02
    return dict(w_pooler=w_pooler, b_pooler=b_pooler,
                w_linear=w_linear, b_linear=b_linear)


if __name__ == "__main__":
    B, D, L = 8, 32, 4  # batch(*num_choices), hidden dim, num_labels

    key = jax.random.PRNGKey(0)
    kx, kp = jax.random.split(key)
    x = jax.random.normal(kx, (B, D), jnp.float32)
    params = init_params(kp, D, L)

    out = multiple_choice_head_forward(x, params["w_linear"], params["b_linear"])
    out = jax.block_until_ready(out)

    # Reference: plain-JAX f32 linear.
    ref = x @ params["w_linear"] + params["b_linear"]
    assert out.shape == (B, L)
    assert jnp.allclose(out, ref, atol=1e-2, rtol=1e-2), (
        float(jnp.max(jnp.abs(out - ref))))

    print("KERNEL_OK")
</pallas_src>

<mosaic_0001>
module attributes {stable_mosaic.version = 11 : i64} {
  func.func @kernel(%arg0: i32, %arg1: memref<8x32xf32, #tpu.memory_space<vmem>>, %arg2: memref<32x128xf32, #tpu.memory_space<vmem>>, %arg3: memref<1x128xf32, #tpu.memory_space<vmem>>, %arg4: memref<8x128xf32, #tpu.memory_space<vmem>>) attributes {dimension_semantics = [#tpu.dimension_semantics<parallel>], iteration_bounds = array<i64: 1>, scalar_prefetch = 0 : i64, scratch_operands = 0 : i64, tpu.core_type = #tpu.core_type<tc>, window_params = [{transform_indices = @transform_0, window_bounds = array<i64: 8, 32>}, {pipeline_mode = #tpu.pipeline_mode<synchronous>, transform_indices = @transform_1, window_bounds = array<i64: 32, 128>}, {pipeline_mode = #tpu.pipeline_mode<synchronous>, transform_indices = @transform_2, window_bounds = array<i64: 1, 128>}, {transform_indices = @transform_3, window_bounds = array<i64: 8, 128>}]} {
    %c0 = arith.constant 0 : index
    %c0_0 = arith.constant 0 : index
    %0 = vector.load %arg1[%c0, %c0_0] : memref<8x32xf32, #tpu.memory_space<vmem>>, vector<8x32xf32>
    %c0_1 = arith.constant 0 : index
    %c0_2 = arith.constant 0 : index
    %1 = vector.load %arg2[%c0_1, %c0_2] : memref<32x128xf32, #tpu.memory_space<vmem>>, vector<32x128xf32>
    %cst = arith.constant dense<0.000000e+00> : vector<8x128xf32>
    %2 = tpu.matmul %0, %1, %cst {dimension_numbers = #tpu.dot_dimension_numbers<[1], [0], [0], [1], [0, 0, 1, 1], [], []>} : vector<8x32xf32>, vector<32x128xf32>, vector<8x128xf32> -> vector<8x128xf32>
    %c0_3 = arith.constant 0 : index
    %c0_4 = arith.constant 0 : index
    %3 = vector.load %arg3[%c0_3, %c0_4] : memref<1x128xf32, #tpu.memory_space<vmem>>, vector<1x128xf32>
    %4 = vector.broadcast %3 : vector<1x128xf32> to vector<8x128xf32>
    %5 = arith.addf %2, %4 : vector<8x128xf32>
    %c0_5 = arith.constant 0 : index
    %c0_6 = arith.constant 0 : index
    %6 = vector.load %arg4[%c0_5, %c0_6] : memref<8x128xf32, #tpu.memory_space<vmem>>, vector<8x128xf32>
    tpu.vector_store %arg4[%c0_5, %c0_6], %5 {strides = array<i32>} : memref<8x128xf32, #tpu.memory_space<vmem>>, vector<8x128xf32>,
    return
  }
  func.func @transform_0(%arg0: i32) -> (i32, i32) {
    %c0_i32 = arith.constant 0 : i32
    %c0_i32_0 = arith.constant 0 : i32
    return %arg0, %c0_i32 : i32, i32
  }
  func.func @transform_1(%arg0: i32) -> (i32, i32) {
    %c0_i32 = arith.constant 0 : i32
    %c0_i32_0 = arith.constant 0 : i32
    %c0_i32_1 = arith.constant 0 : i32
    return %c0_i32, %c0_i32_0 : i32, i32
  }
  func.func @transform_2(%arg0: i32) -> (i32, i32) {
    %c0_i32 = arith.constant 0 : i32
    %c0_i32_0 = arith.constant 0 : i32
    %c0_i32_1 = arith.constant 0 : i32
    return %c0_i32, %c0_i32_0 : i32, i32
  }
  func.func @transform_3(%arg0: i32) -> (i32, i32) {
    %c0_i32 = arith.constant 0 : i32
    %c0_i32_0 = arith.constant 0 : i32
    return %arg0, %c0_i32 : i32, i32
  }
}

</mosaic_0001>

<bundles_post_ra>
// kernel: tpu_custom_call.1
= control target key start
LH: loop header
LB: loop body
LE: loop exit
PB: predicated region body
PF: predicated region fallthrough
CT: control target
= control target key end

     0   :  { %8 = vsyncpa [#allocation3], 0  ;;  %s219_s0 = inlined_call_operand.hbm [shape: f32[8,32], index: 0, kind: input, shape index: {}]   ;;  %s220_s1 = inlined_call_operand.hbm [shape: f32[32,128], index: 1, kind: input, shape index: {}]   ;;  %s221_s2 = inlined_call_operand.vmem [shape: f32[1,128], index: 2, kind: input, shape index: {}]   ;;  %s222_s3 = inlined_call_operand.hbm [shape: f32[8,128], index: 3, kind: output, shape index: {}]  }
   0x1   :  { %9 = vsyncpa [#allocation6], 0 }
   0x2   :  { %10 = vsyncpa [#allocation4], 0  ;;  %s16_s14 = sshll.u32 %s219_s0, 4  ;;  %s182_s15 = smov [#allocation2]   ;;  %s17_s14 = int_to_ptr.hbm [resolvable:$true] %s16_s14 }
   0x3   :  { %s18_s16 = sshll.u32 %s182_s15, 4  ;;  %s26_s19 = sshll.u32 %s220_s1, 4  ;;  %s19_s16 = int_to_ptr.vmem [resolvable:$true] %s18_s16  ;;  %s27_s19 = int_to_ptr.hbm [resolvable:$true] %s26_s19 }
   0x4   :  { %21 = dma.hbm_to_vmem [thread:$0]  %s17_s14, 128, %s19_s16, [#allocation3]  }
   0x5   :  { %s183_s20 = smov [#allocation5]   ;;  %s184_s22 = smov 128  }
   0x6   :  { %s28_s21 = sshll.u32 %s183_s20, 4  ;;  %s185_s23 = smov 8   ;;  %s29_s21 = int_to_ptr.vmem [resolvable:$true] %s28_s21 }
   0x7   :  { %34 = dma.hbm_to_vmem [thread:$0]  %s27_s19, 512, %s29_s21, [#allocation6], %s184_s22, %s184_s22, %s185_s23  }
   0x8   :  { %176 = dma.done.wait [#allocation3], 128  }
   0x9   :  { %177 = vsyncadd [#allocation3], 4294967168 }
   0xa   :  { %178 = dma.done.wait [#allocation6], 512  }
   0xb   :  { %179 = vsyncadd [#allocation6], 4294966784  ;;  %v49_v0 = vld [vmem:[#allocation5 + $0x18] sm:$0xff]  ;;  %v48_v1 = vld [vmem:[#allocation5 + $0x10] sm:$0xff]  ;;  %vm54_vm0 = vcmask 261120   ;;  %s186_s24 = smov [#allocation7]  }
   0xc   :  { %70 = vmatpush.msra.mxu0 %v49_v0  ;;  %v47_v2 = vld [vmem:[#allocation5 + $0x8] sm:$0xff]  ;;  %v46_v3 = vld [vmem:[#allocation5] sm:$0xff]  ;;  %v45_v4 = vld [vmem:[#allocation2] sm:$0xff]  ;;  %s84_s25 = sshll.u32 %s186_s24, 4  ;;  %s86_s28 = sshll.u32 %s222_s3, 4  ;;  %s85_s25 = int_to_ptr.vmem [resolvable:$true] %s84_s25  ;;  %s87_s28 = int_to_ptr.hbm [resolvable:$true] %s86_s28 }
   0xd   :  { %v103_v5 = vld [vmem:[%s221_s2] ss:$0 sm:$0xff] }
   0xe   :  { %71 = vmatpush.msra.mxu0 %v48_v1 }
  0x10   :  { %72 = vmatpush.msra.mxu0 %v47_v2 }
  0x12   :  { %73 = vmatpush.msra.mxu0 %v46_v3 }
  0x13   :  { %97 = vmatmul.msk.f32.vlgmr.msra.gmra.mxu0 %vm54_vm0, %v45_v4 }
  0x90   :  { %v75_v6 = vpop.f32.mrf.mxu0 }
  0x91   :  { %v76_v7 = vadd.f32 %v103_v5, %v75_v6 }
  0x93   :  { %78 = vst [vmem:[#allocation7] sm:$0xff] %v76_v7 }
  0x94   :  { %89 = dma.vmem_to_hbm [thread:$0]  %s85_s25, 128, %s87_s28, [#allocation4]  }
  0x95   :  { %180 = dma.done.wait [#allocation4], 128  }
  0x96   :  { %181 = vsyncadd [#allocation4], 4294967168 }
  0x97   :  { %94 = vsyncpa [#allocation3], 1 }
  0x98   :  { %95 = vsyncpa [#allocation6], 1 }
  0x99   :  { %96 = vsyncpa [#allocation4], 1 }

</bundles_post_ra>
